<compile_context>
chip_gen: v7x
topology: tpu7x:2x2x1
jax: 0.10.0
libtpu: 0.0.40
codegen_flags: <defaults>
</compile_context>

<pallas_src>
import functools

import jax
import jax.numpy as jnp
from jax.experimental import pallas as pl
from jax.experimental.pallas import tpu as pltpu


def _round_up(x, m):
    return (x + m - 1) // m * m


def _bf16_elementwise_ok():
    # v6e / v7x VALUs are bf16-native; v5e and older are not (bf16 there would
    # just add extend/truncate casts around every elementwise op).
    try:
        kind = jax.devices()[0].device_kind.lower()
    except Exception:
        return True
    return not any(v in kind for v in ("v2", "v3", "v4", "v5"))


# ---------------------------------------------------------------------------
# Kernel: one (batch*head, schedule-step) tile.  The schedule step encodes a
# lower-triangular (q_block, kv_block) pair supplied via scalar prefetch.
# ---------------------------------------------------------------------------
def _hs_attn_kernel(qi_ref, kj_ref, q_ref, k_ref, v_ref, o_ref, acc_ref, *,
                    scale_over_6, block_q, block_k, bf16_elementwise):
    t = pl.program_id(1)
    qi = qi_ref[t]          # q-row block index of this schedule step
    kj = kj_ref[t]          # kv-column block index (kj <= qi by construction)

    @pl.when(kj == 0)
    def _init():
        acc_ref[...] = jnp.zeros_like(acc_ref)

    def _accumulate(on_diagonal):
        # bf16 operands straight into the MXU, f32 accumulation.
        s = jax.lax.dot_general(
            q_ref[0], k_ref[0], (((1,), (1,)), ((), ())),
            preferred_element_type=jnp.float32)            # (block_q, block_k) f32
        if bf16_elementwise:
            s = s.astype(jnp.bfloat16)
        dt = s.dtype
        # hard-sigmoid with scale folded in: clamp(scale*s/6 + 1/2, 0, 1)
        p = jnp.clip(s * jnp.asarray(scale_over_6, dt) + jnp.asarray(0.5, dt),
                     jnp.asarray(0.0, dt), jnp.asarray(1.0, dt))
        if on_diagonal:
            # Mask is only needed on the diagonal block of each q row.
            row = qi * block_q + jax.lax.broadcasted_iota(
                jnp.int32, (block_q, block_k), 0)
            col = kj * block_k + jax.lax.broadcasted_iota(
                jnp.int32, (block_q, block_k), 1)
            p = jnp.where(col <= row, p, jnp.asarray(0.0, dt))
        acc_ref[...] += jnp.dot(p.astype(v_ref.dtype), v_ref[0],
                                preferred_element_type=jnp.float32)

    @pl.when(kj < qi)
    def _off_diag():                  # strictly below the diagonal: no mask
        _accumulate(False)

    @pl.when(kj == qi)
    def _diag_and_store():            # diagonal block is the last kv block per row
        _accumulate(True)
        o_ref[0] = acc_ref[...].astype(o_ref.dtype)


# ---------------------------------------------------------------------------
# Attention wrapper: (B, H, T, D) -> (B, H, T, D), causal hard-sigmoid attention.
# ---------------------------------------------------------------------------
def hardsigmoid_flash_attention(q, k, v, *, scale=None, block=512):
    B, H, T, D = q.shape
    if scale is None:
        scale = float(D) ** -0.5

    # Tile rows: multiple of 16 (bf16 sublane packing), capped at (padded) T.
    blk = min(block, _round_up(T, 16))
    blk = _round_up(blk, 16)
    t_pad = _round_up(T, blk)
    if t_pad != T:
        # Zero padding is safe: padded kv columns only appear in diagonal blocks
        # of real rows, where the causal mask zeroes them; padded q rows are
        # sliced off below.
        pad = [(0, 0), (0, 0), (0, t_pad - T), (0, 0)]
        q, k, v = jnp.pad(q, pad), jnp.pad(k, pad), jnp.pad(v, pad)

    qf = q.reshape(B * H, t_pad, D)
    kf = k.reshape(B * H, t_pad, D)
    vf = v.reshape(B * H, t_pad, D)
    nq = t_pad // blk

    # Compacted lower-triangular schedule: only (qi, kj) with kj <= qi exist.
    qi_list, kj_list = [], []
    for i in range(nq):
        for j in range(i + 1):
            qi_list.append(i)
            kj_list.append(j)
    qi_sched = jnp.asarray(qi_list, dtype=jnp.int32)
    kj_sched = jnp.asarray(kj_list, dtype=jnp.int32)
    n_steps = len(qi_list)

    bf16_elem = _bf16_elementwise_ok()
    kernel = functools.partial(
        _hs_attn_kernel, scale_over_6=scale / 6.0,
        block_q=blk, block_k=blk, bf16_elementwise=bf16_elem)

    # VMEM budget from the real footprint (q/k/v/o double-buffered, f32 acc,
    # score-tile temporaries) with 2x headroom; fits v7x's 64 MiB/TC easily.
    itemsize = q.dtype.itemsize
    tile_bytes = blk * D * itemsize
    vmem_needed = (3 * 2 * tile_bytes            # q, k, v double-buffered
                   + 2 * tile_bytes              # output double-buffered
                   + blk * D * 4                 # f32 accumulator scratch
                   + 3 * blk * blk * 4)          # score temporaries (headroom)
    vmem_limit = int(min(max(2 * vmem_needed, 16 * 1024 * 1024), 48 * 1024 * 1024))

    kv_reuse = (nq + 1) / 2.0                    # mean re-reads of each K/V block
    cost = pl.CostEstimate(
        flops=int(2 * B * H * T * T * D),        # causal QK^T + PV
        transcendentals=0,                        # hard-sigmoid is fma + clamp
        bytes_accessed=int(B * H * t_pad * D * itemsize * (2.0 + 2.0 * kv_reuse)),
    )

    out = pl.pallas_call(
        kernel,
        out_shape=jax.ShapeDtypeStruct((B * H, t_pad, D), q.dtype),
        grid_spec=pltpu.PrefetchScalarGridSpec(
            num_scalar_prefetch=2,
            grid=(B * H, n_steps),
            in_specs=[
                pl.BlockSpec((1, blk, D), lambda b, t, qi, kj: (b, qi[t], 0)),  # q
                pl.BlockSpec((1, blk, D), lambda b, t, qi, kj: (b, kj[t], 0)),  # k
                pl.BlockSpec((1, blk, D), lambda b, t, qi, kj: (b, kj[t], 0)),  # v
            ],
            out_specs=pl.BlockSpec((1, blk, D), lambda b, t, qi, kj: (b, qi[t], 0)),
            scratch_shapes=[pltpu.VMEM((blk, D), jnp.float32)],
        ),
        compiler_params=pltpu.CompilerParams(
            dimension_semantics=("parallel", "arbitrary"),
            vmem_limit_bytes=vmem_limit,
        ),
        cost_estimate=cost,
    )(qi_sched, kj_sched, qf, kf, vf)

    out = out.reshape(B, H, t_pad, D)
    if t_pad != T:
        out = out[:, :, :T, :]
    return out


# ---------------------------------------------------------------------------
# Full module forward (c_attn / c_proj are plain XLA matmuls around the kernel).
# ---------------------------------------------------------------------------
def hardsigmoid_attention_forward(x, w_attn, b_attn, w_proj, b_proj, n_head, *, block=512):
    B, T, C = x.shape
    assert C % n_head == 0
    D = C // n_head

    qkv = jnp.einsum("btc,oc->bto", x, w_attn)
    if b_attn is not None:
        qkv = qkv + b_attn
    q, k, v = jnp.split(qkv, 3, axis=-1)

    def to_heads(t):
        return t.reshape(B, T, n_head, D).transpose(0, 2, 1, 3)      # (B, H, T, D)

    # attention_forward casts to bf16 and uses scale = D ** -0.5, causal=True.
    q16 = to_heads(q).astype(jnp.bfloat16)
    k16 = to_heads(k).astype(jnp.bfloat16)
    v16 = to_heads(v).astype(jnp.bfloat16)
    y = hardsigmoid_flash_attention(q16, k16, v16, scale=float(D) ** -0.5, block=block)

    # Back to (B, T, C); resid_dropout is identity (dropout == 0.0 asserted).
    y = y.transpose(0, 2, 1, 3).reshape(B, T, C).astype(x.dtype)
    y = jnp.einsum("btc,oc->bto", y, w_proj)
    if b_proj is not None:
        y = y + b_proj
    return y


if __name__ == "__main__":
    B, T, C, n_head = 2, 8, 32, 4
    D = C // n_head

    key = jax.random.PRNGKey(0)
    kx, ka, kab, kp, kpb, kq, kk, kv = jax.random.split(key, 8)

    x = jax.random.normal(kx, (B, T, C), dtype=jnp.float32)
    w_attn = 0.2 * jax.random.normal(ka, (3 * C, C), dtype=jnp.float32)
    b_attn = 0.02 * jax.random.normal(kab, (3 * C,), dtype=jnp.float32)
    w_proj = 0.2 * jax.random.normal(kp, (C, C), dtype=jnp.float32)
    b_proj = 0.02 * jax.random.normal(kpb, (C,), dtype=jnp.float32)

    # Full module forward through the Pallas attention kernel.
    y = hardsigmoid_attention_forward(x, w_attn, b_attn, w_proj, b_proj, n_head)
    jax.block_until_ready(y)

    # --- correctness check of the attention kernel (test 1: tiny GPT shape) ---
    qkv = jnp.einsum("btc,oc->bto", x, w_attn) + b_attn
    q, k, v = jnp.split(qkv, 3, axis=-1)
    heads = lambda t: t.reshape(B, T, n_head, D).transpose(0, 2, 1, 3)
    q16, k16, v16 = (heads(t).astype(jnp.bfloat16) for t in (q, k, v))

    attn = hardsigmoid_flash_attention(q16, k16, v16, scale=float(D) ** -0.5)
    jax.block_until_ready(attn)

    def ref_attention(q_, k_, v_, scale_):
        qf, kf, vf = (t.astype(jnp.float32) for t in (q_, k_, v_))
        s = jnp.einsum("bhqd,bhkd->bhqk", qf, kf,
                       precision=jax.lax.Precision.HIGHEST) * scale_
        p = jnp.clip(s / 6.0 + 0.5, 0.0, 1.0)
        t_ = q_.shape[2]
        causal = jnp.tril(jnp.ones((t_, t_), dtype=bool))
        p = jnp.where(causal[None, None], p, 0.0)
        return jnp.einsum("bhqk,bhkd->bhqd", p, vf,
                          precision=jax.lax.Precision.HIGHEST)

    ref = ref_attention(q16, k16, v16, float(D) ** -0.5)
    assert jnp.allclose(attn.astype(jnp.float32), ref, atol=1e-1, rtol=5e-2), \
        "attention kernel mismatch vs reference (test 1)"

    # --- test 2: multi-block triangular schedule, diagonal masking, padding ---
    B2, H2, T2, D2 = 1, 2, 40, 8
    q2 = jax.random.normal(kq, (B2, H2, T2, D2), dtype=jnp.float32).astype(jnp.bfloat16)
    k2 = jax.random.normal(kk, (B2, H2, T2, D2), dtype=jnp.float32).astype(jnp.bfloat16)
    v2 = jax.random.normal(kv, (B2, H2, T2, D2), dtype=jnp.float32).astype(jnp.bfloat16)

    attn2 = hardsigmoid_flash_attention(q2, k2, v2, scale=float(D2) ** -0.5, block=16)
    jax.block_until_ready(attn2)
    ref2 = ref_attention(q2, k2, v2, float(D2) ** -0.5)
    assert jnp.allclose(attn2.astype(jnp.float32), ref2, atol=1e-1, rtol=5e-2), \
        "attention kernel mismatch vs reference (test 2, padded/multi-block)"

    print("KERNEL_OK")
</pallas_src>

<mosaic_0001>
module attributes {stable_mosaic.version = 11 : i64} {
  func.func @_hs_attn_kernel(%arg0: i32, %arg1: i32, %arg2: memref<1xi32, #tpu.memory_space<smem>>, %arg3: memref<1xi32, #tpu.memory_space<smem>>, %arg4: memref<1x16x8xbf16, #tpu.memory_space<vmem>>, %arg5: memref<1x16x8xbf16, #tpu.memory_space<vmem>>, %arg6: memref<1x16x8xbf16, #tpu.memory_space<vmem>>, %arg7: memref<1x16x8xbf16, #tpu.memory_space<vmem>>, %arg8: memref<16x8xf32, #tpu.memory_space<vmem>>) attributes {dimension_semantics = [#tpu.dimension_semantics<parallel>, #tpu.dimension_semantics<arbitrary>], iteration_bounds = array<i64: 8, 1>, scalar_prefetch = 2 : i64, scratch_operands = 1 : i64, tpu.core_type = #tpu.core_type<tc>, window_params = [{transform_indices = @transform_0, window_bounds = array<i64: 1, 16, 8>}, {transform_indices = @transform_1, window_bounds = array<i64: 1, 16, 8>}, {transform_indices = @transform_2, window_bounds = array<i64: 1, 16, 8>}, {transform_indices = @transform_3, window_bounds = array<i64: 1, 16, 8>}]} {
    %0 = arith.index_cast %arg1 : i32 to index
    %1 = memref.load %arg2[%0] : memref<1xi32, #tpu.memory_space<smem>>
    %2 = arith.index_cast %arg1 : i32 to index
    %3 = memref.load %arg3[%2] : memref<1xi32, #tpu.memory_space<smem>>
    %c0_i32 = arith.constant 0 : i32
    %4 = arith.cmpi eq, %3, %c0_i32 : i32
    %5 = arith.extui %4 : i1 to i32
    %c0_i32_0 = arith.constant 0 : i32
    %6 = arith.cmpi ne, %5, %c0_i32_0 : i32
    scf.if %6 {
      %cst = arith.constant 0.000000e+00 : f32
      %13 = vector.broadcast %cst : f32 to vector<16x8xf32>
      %c0 = arith.constant 0 : index
      %c0_3 = arith.constant 0 : index
      %14 = vector.load %arg8[%c0, %c0_3] : memref<16x8xf32, #tpu.memory_space<vmem>>, vector<16x8xf32>
      tpu.vector_store %arg8[%c0, %c0_3], %13 {strides = array<i32>} : memref<16x8xf32, #tpu.memory_space<vmem>>, vector<16x8xf32>,
    } else {
    }
    %7 = arith.cmpi slt, %3, %1 : i32
    %8 = arith.extui %7 : i1 to i32
    %c0_i32_1 = arith.constant 0 : i32
    %9 = arith.cmpi ne, %8, %c0_i32_1 : i32
    scf.if %9 {
      %c0 = arith.constant 0 : index
      %c0_3 = arith.constant 0 : index
      %c0_4 = arith.constant 0 : index
      %13 = vector.load %arg4[%c0, %c0_3, %c0_4] : memref<1x16x8xbf16, #tpu.memory_space<vmem>>, vector<1x16x8xbf16>
      %14 = vector.shape_cast %13 : vector<1x16x8xbf16> to vector<16x8xbf16>
      %c0_5 = arith.constant 0 : index
      %c0_6 = arith.constant 0 : index
      %c0_7 = arith.constant 0 : index
      %15 = vector.load %arg5[%c0_5, %c0_6, %c0_7] : memref<1x16x8xbf16, #tpu.memory_space<vmem>>, vector<1x16x8xbf16>
      %16 = vector.shape_cast %15 : vector<1x16x8xbf16> to vector<16x8xbf16>
      %cst = arith.constant dense<0.000000e+00> : vector<16x16xf32>
      %17 = tpu.matmul %14, %16, %cst {dimension_numbers = #tpu.dot_dimension_numbers<[1], [1], [0], [0], [0, 0, 1, 0], [], []>} : vector<16x8xbf16>, vector<16x8xbf16>, vector<16x16xf32> -> vector<16x16xf32>
      %18 = arith.truncf %17 : vector<16x16xf32> to vector<16x16xbf16>
      %cst_8 = arith.constant 5.883790e-02 : bf16
      %19 = vector.broadcast %cst_8 : bf16 to vector<16x16xbf16>
      %20 = arith.mulf %18, %19 : vector<16x16xbf16>
      %cst_9 = arith.constant 5.000000e-01 : bf16
      %21 = vector.broadcast %cst_9 : bf16 to vector<16x16xbf16>
      %22 = arith.addf %20, %21 : vector<16x16xbf16>
      %cst_10 = arith.constant 0.000000e+00 : bf16
      %cst_11 = arith.constant 1.000000e+00 : bf16
      %23 = vector.broadcast %cst_10 : bf16 to vector<16x16xbf16>
      %24 = arith.maximumf %23, %22 : vector<16x16xbf16>
      %25 = vector.broadcast %cst_11 : bf16 to vector<16x16xbf16>
      %26 = arith.minimumf %25, %24 : vector<16x16xbf16>
      %c0_12 = arith.constant 0 : index
      %c0_13 = arith.constant 0 : index
      %27 = vector.load %arg8[%c0_12, %c0_13] : memref<16x8xf32, #tpu.memory_space<vmem>>, vector<16x8xf32>
      %c0_14 = arith.constant 0 : index
      %c0_15 = arith.constant 0 : index
      %c0_16 = arith.constant 0 : index
      %28 = vector.load %arg6[%c0_14, %c0_15, %c0_16] : memref<1x16x8xbf16, #tpu.memory_space<vmem>>, vector<1x16x8xbf16>
      %29 = vector.shape_cast %28 : vector<1x16x8xbf16> to vector<16x8xbf16>
      %cst_17 = arith.constant dense<0.000000e+00> : vector<16x8xf32>
      %30 = tpu.matmul %26, %29, %cst_17 {dimension_numbers = #tpu.dot_dimension_numbers<[1], [0], [0], [1], [0, 0, 1, 1], [], []>} : vector<16x16xbf16>, vector<16x8xbf16>, vector<16x8xf32> -> vector<16x8xf32>
      %31 = arith.addf %27, %30 : vector<16x8xf32>
      %c0_18 = arith.constant 0 : index
      %c0_19 = arith.constant 0 : index
      %32 = vector.load %arg8[%c0_18, %c0_19] : memref<16x8xf32, #tpu.memory_space<vmem>>, vector<16x8xf32>
      tpu.vector_store %arg8[%c0_18, %c0_19], %31 {strides = array<i32>} : memref<16x8xf32, #tpu.memory_space<vmem>>, vector<16x8xf32>,
    } else {
    }
    %10 = arith.cmpi eq, %3, %1 : i32
    %11 = arith.extui %10 : i1 to i32
    %c0_i32_2 = arith.constant 0 : i32
    %12 = arith.cmpi ne, %11, %c0_i32_2 : i32
    scf.if %12 {
      %c0 = arith.constant 0 : index
      %c0_3 = arith.constant 0 : index
      %c0_4 = arith.constant 0 : index
      %13 = vector.load %arg4[%c0, %c0_3, %c0_4] : memref<1x16x8xbf16, #tpu.memory_space<vmem>>, vector<1x16x8xbf16>
      %14 = vector.shape_cast %13 : vector<1x16x8xbf16> to vector<16x8xbf16>
      %c0_5 = arith.constant 0 : index
      %c0_6 = arith.constant 0 : index
      %c0_7 = arith.constant 0 : index
      %15 = vector.load %arg5[%c0_5, %c0_6, %c0_7] : memref<1x16x8xbf16, #tpu.memory_space<vmem>>, vector<1x16x8xbf16>
      %16 = vector.shape_cast %15 : vector<1x16x8xbf16> to vector<16x8xbf16>
      %cst = arith.constant dense<0.000000e+00> : vector<16x16xf32>
      %17 = tpu.matmul %14, %16, %cst {dimension_numbers = #tpu.dot_dimension_numbers<[1], [1], [0], [0], [0, 0, 1, 0], [], []>} : vector<16x8xbf16>, vector<16x8xbf16>, vector<16x16xf32> -> vector<16x16xf32>
      %18 = arith.truncf %17 : vector<16x16xf32> to vector<16x16xbf16>
      %cst_8 = arith.constant 5.883790e-02 : bf16
      %19 = vector.broadcast %cst_8 : bf16 to vector<16x16xbf16>
      %20 = arith.mulf %18, %19 : vector<16x16xbf16>
      %cst_9 = arith.constant 5.000000e-01 : bf16
      %21 = vector.broadcast %cst_9 : bf16 to vector<16x16xbf16>
      %22 = arith.addf %20, %21 : vector<16x16xbf16>
      %cst_10 = arith.constant 0.000000e+00 : bf16
      %cst_11 = arith.constant 1.000000e+00 : bf16
      %23 = vector.broadcast %cst_10 : bf16 to vector<16x16xbf16>
      %24 = arith.maximumf %23, %22 : vector<16x16xbf16>
      %25 = vector.broadcast %cst_11 : bf16 to vector<16x16xbf16>
      %26 = arith.minimumf %25, %24 : vector<16x16xbf16>
      %c16_i32 = arith.constant 16 : i32
      %27 = arith.muli %1, %c16_i32 : i32
      %28 = tpu.iota {dimensions = array<i32: 0>} : vector<16x16xi32>
      %29 = vector.broadcast %27 : i32 to vector<16x16xi32>
      %30 = arith.addi %29, %28 : vector<16x16xi32>
      %c16_i32_12 = arith.constant 16 : i32
      %31 = arith.muli %3, %c16_i32_12 : i32
      %32 = tpu.iota {dimensions = array<i32: 1>} : vector<16x16xi32>
      %33 = vector.broadcast %31 : i32 to vector<16x16xi32>
      %34 = arith.addi %33, %32 : vector<16x16xi32>
      %35 = arith.cmpi sle, %34, %30 : vector<16x16xi32>
      %cst_13 = arith.constant 0.000000e+00 : bf16
      %36 = vector.broadcast %cst_13 : bf16 to vector<16x16xbf16>
      %37 = arith.select %35, %26, %36 : vector<16x16xi1>, vector<16x16xbf16>
      %c0_14 = arith.constant 0 : index
      %c0_15 = arith.constant 0 : index
      %38 = vector.load %arg8[%c0_14, %c0_15] : memref<16x8xf32, #tpu.memory_space<vmem>>, vector<16x8xf32>
      %c0_16 = arith.constant 0 : index
      %c0_17 = arith.constant 0 : index
      %c0_18 = arith.constant 0 : index
      %39 = vector.load %arg6[%c0_16, %c0_17, %c0_18] : memref<1x16x8xbf16, #tpu.memory_space<vmem>>, vector<1x16x8xbf16>
      %40 = vector.shape_cast %39 : vector<1x16x8xbf16> to vector<16x8xbf16>
      %cst_19 = arith.constant dense<0.000000e+00> : vector<16x8xf32>
      %41 = tpu.matmul %37, %40, %cst_19 {dimension_numbers = #tpu.dot_dimension_numbers<[1], [0], [0], [1], [0, 0, 1, 1], [], []>} : vector<16x16xbf16>, vector<16x8xbf16>, vector<16x8xf32> -> vector<16x8xf32>
      %42 = arith.addf %38, %41 : vector<16x8xf32>
      %c0_20 = arith.constant 0 : index
      %c0_21 = arith.constant 0 : index
      %43 = vector.load %arg8[%c0_20, %c0_21] : memref<16x8xf32, #tpu.memory_space<vmem>>, vector<16x8xf32>
      tpu.vector_store %arg8[%c0_20, %c0_21], %42 {strides = array<i32>} : memref<16x8xf32, #tpu.memory_space<vmem>>, vector<16x8xf32>,
      %c0_22 = arith.constant 0 : index
      %c0_23 = arith.constant 0 : index
      %44 = vector.load %arg8[%c0_22, %c0_23] : memref<16x8xf32, #tpu.memory_space<vmem>>, vector<16x8xf32>
      %45 = arith.truncf %44 : vector<16x8xf32> to vector<16x8xbf16>
      %c0_24 = arith.constant 0 : index
      %c0_25 = arith.constant 0 : index
      %c0_26 = arith.constant 0 : index
      %46 = vector.load %arg7[%c0_24, %c0_25, %c0_26] : memref<1x16x8xbf16, #tpu.memory_space<vmem>>, vector<1x16x8xbf16>
      %47 = vector.shape_cast %46 : vector<1x16x8xbf16> to vector<16x8xbf16>
      %48 = vector.shape_cast %45 : vector<16x8xbf16> to vector<1x16x8xbf16>
      tpu.vector_store %arg7[%c0_24, %c0_25, %c0_26], %48 {strides = array<i32>} : memref<1x16x8xbf16, #tpu.memory_space<vmem>>, vector<1x16x8xbf16>,
    } else {
    }
    return
  }
  func.func @transform_0(%arg0: i32, %arg1: i32, %arg2: memref<1xi32, #tpu.memory_space<smem>>, %arg3: memref<1xi32, #tpu.memory_space<smem>>) -> (i32, i32, i32) {
    %0 = arith.index_cast %arg1 : i32 to index
    %1 = memref.load %arg2[%0] : memref<1xi32, #tpu.memory_space<smem>>
    %c0_i32 = arith.constant 0 : i32
    %c0_i32_0 = arith.constant 0 : i32
    return %arg0, %1, %c0_i32 : i32, i32, i32
  }
  func.func @transform_1(%arg0: i32, %arg1: i32, %arg2: memref<1xi32, #tpu.memory_space<smem>>, %arg3: memref<1xi32, #tpu.memory_space<smem>>) -> (i32, i32, i32) {
    %0 = arith.index_cast %arg1 : i32 to index
    %1 = memref.load %arg3[%0] : memref<1xi32, #tpu.memory_space<smem>>
    %c0_i32 = arith.constant 0 : i32
    %c0_i32_0 = arith.constant 0 : i32
    return %arg0, %1, %c0_i32 : i32, i32, i32
  }
  func.func @transform_2(%arg0: i32, %arg1: i32, %arg2: memref<1xi32, #tpu.memory_space<smem>>, %arg3: memref<1xi32, #tpu.memory_space<smem>>) -> (i32, i32, i32) {
    %0 = arith.index_cast %arg1 : i32 to index
    %1 = memref.load %arg3[%0] : memref<1xi32, #tpu.memory_space<smem>>
    %c0_i32 = arith.constant 0 : i32
    %c0_i32_0 = arith.constant 0 : i32
    return %arg0, %1, %c0_i32 : i32, i32, i32
  }
  func.func @transform_3(%arg0: i32, %arg1: i32, %arg2: memref<1xi32, #tpu.memory_space<smem>>, %arg3: memref<1xi32, #tpu.memory_space<smem>>) -> (i32, i32, i32) {
    %0 = arith.index_cast %arg1 : i32 to index
    %1 = memref.load %arg2[%0] : memref<1xi32, #tpu.memory_space<smem>>
    %c0_i32 = arith.constant 0 : i32
    %c0_i32_0 = arith.constant 0 : i32
    return %arg0, %1, %c0_i32 : i32, i32, i32
  }
}

</mosaic_0001>

<bundles_post_ra>
// kernel: tpu_custom_call.1
= control target key start
LH: loop header
LB: loop body
LE: loop exit
PB: predicated region body
PF: predicated region fallthrough
CT: control target
= control target key end

     0   :  { %s918_s22 = smov 0   ;;  %s920_s23 = smov 0   ;;  %s994_s0 = inlined_call_operand.<no memory space> [shape: s32[1], index: 0, kind: input, shape index: {}]   ;;  %s995_s1 = inlined_call_operand.<no memory space> [shape: s32[1], index: 1, kind: input, shape index: {}]   ;;  %s996_s2 = inlined_call_operand.vmem [shape: bf16[8,16,8], index: 2, kind: input, shape index: {}]   ;;  %s997_s3 = inlined_call_operand.vmem [shape: bf16[8,16,8], index: 3, kind: input, shape index: {}]   ;;  %s998_s4 = inlined_call_operand.vmem [shape: bf16[8,16,8], index: 4, kind: input, shape index: {}]   ;;  %s999_s5 = inlined_call_operand.vmem [shape: bf16[8,16,8], index: 5, kind: output, shape index: {}]  }
   0x1   :  { %10 = sst [smem:[#allocation4]] %s994_s0  ;;  %s922_s24 = smov 0  }
   0x2   :  { %11 = sst [smem:[#allocation5]] %s995_s1 }
   0x3 LB: > { %s29_s0 = sadd.s32 1, %s867_s23  ;;  %p744_p0 = scmp.ge.s32.totalorder %s871_s24, 1  ;;  %s871_s24 = sphi %s922_s24, %s17_s24   ;;  %s867_s23 = sphi %s920_s23, %s1001_s23   ;;  %s863_s22 = sphi %s918_s22, %s1000_s22  }
   0x4   : > { %p31_p1 = scmp.ge.s32.totalorder %s29_s0, 8  ;;  %p210_p2 = scmp.lt.s32.totalorder %s871_s24, 9 }
   0x6   : > { %s1003_s0 = smov (%p31_p1, %s29_s0), 0  ;;  %p211_p3 = pnand %p744_p0, %p210_p2 }
   0x7   : > { %s936_s1 = sld [smem:[#allocation4]] (!%p211_p3)  ;;  %p266_p4 = scmp.lt.s32.totalorder (!%p211_p3), %s863_s22, 7 }
   0x8   : > { %214 = sbr.rel (%p211_p3) target bundleno = 945 (0x3b1), region = 32  ;;  %s938_s25 = sld [smem:[#allocation5]] (!%p211_p3) }
   0xd   : > { %s745_s26 = sshll.u32 (!%p211_p3), %s936_s1, 1 }
   0xe   : > { %p268_p5 = scmp.lt.s32.totalorder (!%p211_p3), %s745_s26, 1  ;;  %s748_s27 = sshll.u32 (!%p211_p3), %s938_s25, 1 }
   0xf   : > { %s1005_s22 = smov (!%p266_p4, %s863_s22), 7  ;;  %p280_p6 = scmp.lt.s32.totalorder %s748_s27, 1 }
  0x10   : > { %s746_s28 = sshll.u32 %s1005_s22, 1  ;;  %s1007_s26 = smov (!%p268_p5, %s745_s26), 1 }
  0x11   : > { %s1009_s27 = smov (!%p280_p6, %s748_s27), 1  ;;  %s271_s29 = sadd.s32 %s746_s28, %s1007_s26 }
  0x12   : > { %s747_s30 = sshll.u32 %s271_s29, 2  ;;  %s283_s6 = sadd.s32 %s746_s28, %s1009_s27 }
  0x13   : > { %s945_s9 = scalar_lea.vmem %s996_s2, %s747_s30  ;;  %s750_s10 = sshll.u32 %s283_s6, 2 }
  0x14   : > { %s950_s13 = scalar_lea.vmem %s997_s3, %s750_s10  ;;  %s955_s16 = scalar_lea.vmem %s998_s4, %s750_s10 }
  0x15   : > { %s960_s19 = scalar_lea.vmem %s999_s5, %s747_s30  ;;  %p757_p7 = scmp.ne.s32.totalorder %s938_s25, 0 }
  0x16   : > { %vm322_vm0 = vcmask (!%p757_p7), 64512   ;;  %v873_v0 = vmov (!%p757_p7), 0.0  }
  0x17   : > { %321 = sbr.rel (%p757_p7) target bundleno = 30 (0x1e), region = 36  ;;  %323 = vst.msk [vmem:[#allocation2] sm:$0xff] (!%p757_p7), %vm322_vm0, %v873_v0  ;;  %324 = vst.msk [vmem:[#allocation2 + $0x8] sm:$0xff] (!%p757_p7), %vm322_vm0, %v873_v0 }
  0x1e PF: > { %p758_p8 = scmp.ge.s32.totalorder %s938_s25, %s936_s1 }
  0x1f   : > { %v843_v1 = vld [vmem:[%s950_s13] sm:$0xff] (!%p758_p8)   ;;  %v874_v2 = vmov (!%p758_p8), 0.0   ;;  %vm343_vm1 = vcmask (!%p758_p8), 64512   ;;  %vm875_vm2 = vmmov (!%p758_p8), 0   ;;  %v876_v13 = vmov (!%p758_p8), 0   ;;  %v397_v19 = vld [vmem:[#allocation2 + $0x8] sm:$0xff] (!%p758_p8) }
  0x20   : > { %328 = sbr.rel (%p758_p8) target bundleno = 482 (0x1e2), region = 40  ;;  %786 = vmatprep.subr.bf16.mxu0 (!%p758_p8), %v874_v2  ;;  %792 = vmatprep.subr.bf16.mxu1 (!%p758_p8), %v874_v2  ;;  %v348_v3 = vsel (!%p758_p8), %vm343_vm1, %v843_v1, 0  ;;  %v844_v4 = vld [vmem:[%s945_s9] sm:$0xff] (!%p758_p8)   ;;  %vm406_vm3 = vcmask (!%p758_p8), 130048   ;;  %v877_v15 = vmov (!%p758_p8), 1065369472  }
  0x21   : > { %788 = vmatprep.mubr.msk.bf16.mxu0 (!%p758_p8), %vm875_vm2, %v874_v2  ;;  %794 = vmatprep.mubr.msk.bf16.mxu1 (!%p758_p8), %vm875_vm2, %v874_v2  ;;  %v845_v5 = vld [vmem:[%s955_s16] sm:$0xff] (!%p758_p8)  }
  0x22   : > { %787 = vmatpush3.bf16.xpose.msra.mxu0 (!%p758_p8), %v348_v3  ;;  %793 = vmatpush3.bf16.msra.mxu1 (!%p758_p8), %v845_v5  ;;  %v396_v17 = vld [vmem:[#allocation2] sm:$0xff] (!%p758_p8) }
  0x29   : > { %789 = vmatmul.mubr.msk.bf16.vlgmr.msra.gmra.mrb[0].mxu0 %vm343_vm1, %v844_v4 }
  0xfc   : > { %v384_v6 = vpop.f32.mrb[0].mxu0 }
  0xfd   : > { %v790_v7 = vpop.f32.mrb[1].mxu0 }
  0xfe   : > { %v387_v8 = vpop.f32.mrb[2].mxu0 }
  0xff   : > { %v391_v9 = vpack.c.bf16 %v387_v8, %v384_v6  ;;  %v791_v10 = vpop.f32.mrb[3].mxu0 }
 0x101   : > { %v392_v11 = vmul.bf16 1030831473, %v391_v9 }
 0x103   : > { %v393_v12 = vadd.bf16 1056980736, %v392_v11 }
 0x105   : > { %v394_v14 = vmax.bf16 %v876_v13, %v393_v12 }
 0x107   : > { %v395_v16 = vmin.bf16 %v877_v15, %v394_v14 }
 0x109   : > { %795 = vmatmul.mubr.msk.bf16.vlgmr.msra.gmra.mrb[0].mxu1 %vm406_vm3, %v395_v16 }
 0x1dc   : > { %v444_v18 = vpop.f32.mrb[0].mxu1 }
 0x1dd   : > { %v451_v20 = vadd.f32 %v444_v18, %v396_v17  ;;  %v796_v21 = vpop.f32.mrb[1].mxu1 }
 0x1de   : > { %v447_v22 = vpop.f32.mrb[2].mxu1 }
 0x1df   : > { %453 = vst.msk [vmem:[#allocation2] sm:$0xff] %vm343_vm1, %v451_v20  ;;  %v452_v23 = vadd.f32 %v447_v22, %v397_v19  ;;  %v797_v24 = vpop.f32.mrb[3].mxu1 }
 0x1e1   : > { %454 = vst.msk [vmem:[#allocation2 + $0x8] sm:$0xff] %vm343_vm1, %v452_v23 }
 0x1e2 PF: > { %p764_p9 = scmp.ne.s32.totalorder %s938_s25, %s936_s1 }
 0x1e3   : > { %v846_v25 = vld [vmem:[%s950_s13] sm:$0xff] (!%p764_p9)   ;;  %v878_v26 = vmov (!%p764_p9), 0.0   ;;  %vm473_vm4 = vcmask (!%p764_p9), 64512   ;;  %vm879_vm5 = vmmov (!%p764_p9), 0   ;;  %v527_v30 = vlaneseq (!%p764_p9)  ;;  %s768_s20 = sshll.u32 (!%p764_p9), %s936_s1, 4  ;;  %s769_s21 = sshll.u32 (!%p764_p9), %s938_s25, 4 }
 0x1e4   : > { %458 = sbr.rel (%p764_p9) target bundleno = 945 (0x3b1), region = 44  ;;  %798 = vmatprep.subr.bf16.mxu0 (!%p764_p9), %v878_v26  ;;  %804 = vmatprep.subr.bf16.mxu1 (!%p764_p9), %v878_v26  ;;  %v478_v27 = vsel (!%p764_p9), %vm473_vm4, %v846_v25, 0  ;;  %v847_v28 = vld [vmem:[%s945_s9] sm:$0xff] (!%p764_p9)   ;;  %v530_v35 = vstv (!%p764_p9), %s768_s20  ;;  %v536_v36 = vstv (!%p764_p9), %s769_s21  ;;  %v880_v46 = vmov (!%p764_p9), 0  }
 0x1e5   : > { %800 = vmatprep.mubr.msk.bf16.mxu0 (!%p764_p9), %vm879_vm5, %v878_v26  ;;  %806 = vmatprep.mubr.msk.bf16.mxu1 (!%p764_p9), %vm879_vm5, %v878_v26  ;;  %v848_v29 = vld [vmem:[%s955_s16] sm:$0xff] (!%p764_p9)   ;;  %v528_v31 = vshrl.u32 (!%p764_p9), %v527_v30, 7  ;;  %v535_v33 = vand.u32 (!%p764_p9), 127, %v527_v30  ;;  %v881_v48 = vmov (!%p764_p9), 1065369472   ;;  %vm552_vm9 = vcmask (!%p764_p9), 130048  }
 0x1e6   : > { %799 = vmatpush3.bf16.xpose.msra.mxu0 (!%p764_p9), %v478_v27  ;;  %805 = vmatpush3.bf16.msra.mxu1 (!%p764_p9), %v848_v29  ;;  %v542_v51 = vld [vmem:[#allocation2] sm:$0xff] (!%p764_p9)  ;;  %vm611_vm10 = vcmask (!%p764_p9), 60416  }
 0x1e7   : > { %v529_v32 = vadd.s32 (!%p764_p9), 8, %v528_v31  ;;  %v531_v41 = vadd.s32 (!%p764_p9), %v530_v35, %v528_v31  ;;  %v537_v43 = vadd.s32 (!%p764_p9), %v536_v36, %v535_v33 }
 0x1e8   : > { %v543_v53 = vld [vmem:[#allocation2 + $0x8] sm:$0xff] (!%p764_p9) }
 0x1e9   : > { %v532_v42 = vadd.s32 (!%p764_p9), %v530_v35, %v529_v32  ;;  %vm538_vm6 = vcmp.le.s32.totalorder (!%p764_p9), %v537_v43, %v531_v41 }
 0x1eb   : > { %vm539_vm7 = vcmp.le.s32.totalorder %v537_v43, %v532_v42 }
 0x1ec   : > { %vm540_vm8 = vmpackc.low %vm539_vm7, %vm538_vm6 }
 0x1ed   : > { %801 = vmatmul.mubr.msk.bf16.vlgmr.msra.gmra.mrb[0].mxu0 %vm473_vm4, %v847_v28 }
 0x2c0   : > { %v514_v34 = vpop.f32.mrb[0].mxu0 }
 0x2c1   : > { %v802_v37 = vpop.f32.mrb[1].mxu0 }
 0x2c2   : > { %v517_v38 = vpop.f32.mrb[2].mxu0 }
 0x2c3   : > { %v521_v39 = vpack.c.bf16 %v517_v38, %v514_v34  ;;  %v803_v40 = vpop.f32.mrb[3].mxu0 }
 0x2c5   : > { %v522_v44 = vmul.bf16 1030831473, %v521_v39 }
 0x2c7   : > { %v523_v45 = vadd.bf16 1056980736, %v522_v44 }
 0x2c9   : > { %v524_v47 = vmax.bf16 %v880_v46, %v523_v45 }
 0x2cb   : > { %v525_v49 = vmin.bf16 %v881_v48, %v524_v47 }
 0x2cd   : > { %v541_v50 = vsel %vm540_vm8, %v525_v49, 0 }
 0x2ce   : > { %807 = vmatmul.mubr.msk.bf16.vlgmr.msra.gmra.mrb[0].mxu1 %vm552_vm9, %v541_v50 }
 0x3a1   : > { %v590_v52 = vpop.f32.mrb[0].mxu1 }
 0x3a2   : > { %v597_v54 = vadd.f32 %v590_v52, %v542_v51  ;;  %v808_v55 = vpop.f32.mrb[1].mxu1 }
 0x3a3   : > { %v593_v56 = vpop.f32.mrb[2].mxu1 }
 0x3a4   : > { %599 = vst.msk [vmem:[#allocation2] sm:$0xff] %vm473_vm4, %v597_v54  ;;  %v598_v57 = vadd.f32 %v593_v56, %v543_v53  ;;  %v809_v58 = vpop.f32.mrb[3].mxu1 }
 0x3a6   : > { %600 = vst.msk [vmem:[#allocation2 + $0x8] sm:$0xff] %vm473_vm4, %v598_v57 }
 0x3ab   : > { %v601_v59 = vld [vmem:[#allocation2] sm:$0xff] }
 0x3ac   : > { %v776_v60 = vpack.c.bf16 %v601_v59, %v601_v59 }
 0x3ad   : > { %v602_v61 = vld [vmem:[#allocation2 + $0x8] sm:$0xff] }
 0x3ae   : > { %612 = vst.msk [vmem:[%s960_s19] sm:$0xf] %vm611_vm10, %v776_v60  ;;  %v777_v62 = vpack.c.bf16 %v602_v61, %v602_v61 }
 0x3b0   : > { %613 = vst.msk [vmem:[%s960_s19 + $0x4] sm:$0xf] %vm611_vm10, %v777_v62 }
 0x3b1 PF: > { %s17_s24 = sadd.s32 1, %s871_s24   ;;  %s1000_s22 = smov %s867_s23 }
 0x3b2   : > { %p14_p10 = scmp.ge.s32.totalorder %s17_s24, 10   ;;  %s1001_s23 = smov %s1003_s0 }
 0x3b4   :  { %16 = sbr.rel (!%p14_p10) target bundleno = 3 (0x3), region = 80 }

</bundles_post_ra>
